<compile_context>
chip_gen: v7x
topology: tpu7x:2x2x1
jax: 0.10.0
libtpu: 0.0.40
codegen_flags: <defaults>
</compile_context>

<pallas_src>
import jax
import jax.numpy as jnp
from jax.experimental import pallas as pl
from jax.experimental.pallas import tpu as pltpu


def gmf_kernel(u_ref, i_ref, w_ref, b_ref, out_ref):
    # u_ref, i_ref : (F, TB)  gathered user/item embedding tiles (bf16)
    #                (latent factors on sublanes, batch rows on lanes)
    # w_ref        : (F, 1)   predict-layer weight, f32, resident (constant index_map)
    # b_ref        : (1, 1)   predict-layer bias in SMEM (scalar)
    # out_ref      : (1, TB)  lane-dense f32 output tile
    u = u_ref[...].astype(jnp.float32)                                # VPU upcast (free slack)
    i = i_ref[...].astype(jnp.float32)
    weighted = (u * i) * w_ref[...]                                   # GMF elementwise + W broadcast (VPU)
    logit = jnp.sum(weighted, axis=0, keepdims=True) + b_ref[0, 0]    # F->1 sublane reduce (XLU)
    out_ref[...] = jax.nn.sigmoid(logit)                              # Sigmoid (EUP)


def _round_up(x, m):
    return ((x + m - 1) // m) * m


def _pick_tb(B, F, in_itemsize, tb_max=8192):
    """Pick the batch-lane tile size.

    * Cap at ~half the 128-rounded batch so small batches don't gather/compute on
      padding and, when B allows, there are at least 2 tiles to shard across the
      two TensorCores of v7x via the "parallel" batch grid axis.
    * Keep double-buffered inputs + output comfortably under the scoped VMEM limit
      (and under v7x's 64 MiB physical VMEM) even if F grows.
    """
    tb = min(tb_max, _round_up(max((B + 1) // 2, 1), 128))
    tb = max(tb, 128)
    # bytes per batch-lane: 2 inputs x 2 buffers x F x itemsize  +  2 buffers x 4B output
    per_lane = 4 * F * in_itemsize + 8
    budget = 24 * 1024 * 1024
    while tb > 128 and tb * per_lane > budget:
        tb -= 128
    return tb


def gmf_forward(users, items, user_emb, item_emb, w, b, *, tb=None,
                input_dtype=jnp.bfloat16):
    """users, items: (B,) int32.  Returns (B,) float32 predictions."""
    B = users.shape[0]
    F = user_emb.shape[1]

    itemsize = jnp.dtype(input_dtype).itemsize
    if tb is None:
        tb = _pick_tb(B, F, itemsize)

    Bp = _round_up(B, tb)
    nb = Bp // tb

    users_p = jnp.pad(users, (0, Bp - B))            # pad with id 0 (valid rows, sliced off later)
    items_p = jnp.pad(items, (0, Bp - B))

    # Wrapper-side embedding gather (one XLA gather per table), transposed so the kernel
    # gets lane-dense (F, TB) tiles, narrowed to bf16 to halve kernel-side HBM traffic.
    # TODO(synk): when the embedding tables are small enough to be VMEM-resident, move the
    # gather in-kernel (scalar-prefetched indices + resident tables) so the (F, Bp)
    # intermediates never hit HBM.
    u_g = user_emb[users_p].T.astype(input_dtype)    # (F, Bp)
    i_g = item_emb[items_p].T.astype(input_dtype)    # (F, Bp)
    w_t = w.reshape(1, F).T.astype(jnp.float32)      # (F, 1)
    b_s = b.reshape(1, 1).astype(jnp.float32)        # (1, 1) scalar bias -> SMEM

    out = pl.pallas_call(
        gmf_kernel,
        out_shape=jax.ShapeDtypeStruct((1, Bp), jnp.float32),
        grid_spec=pltpu.PrefetchScalarGridSpec(
            num_scalar_prefetch=0,
            grid=(nb,),
            in_specs=[
                # gathered user embeddings: (F, tb) lane-dense bf16 tile per grid step
                pl.BlockSpec((F, tb), lambda g: (0, g)),
                # gathered item embeddings: (F, tb) lane-dense bf16 tile per grid step
                pl.BlockSpec((F, tb), lambda g: (0, g)),
                # predict-layer weight (F, 1): same resident block every step
                pl.BlockSpec((F, 1), lambda g: (0, 0)),
                # predict-layer bias: scalar in SMEM
                pl.BlockSpec(memory_space=pltpu.MemorySpace.SMEM),
            ],
            out_specs=pl.BlockSpec((1, tb), lambda g: (0, g)),
        ),
        compiler_params=pltpu.CompilerParams(
            dimension_semantics=("parallel",)),
    )(u_g, i_g, w_t, b_s)

    # torch: output.view(-1); drop batch padding.
    return out.reshape(-1)[:B]


def _reference(users, items, user_emb, item_emb, w, b):
    return jax.nn.sigmoid(
        (user_emb[users] * item_emb[items]) @ w.T + b[0]
    ).reshape(-1)


if __name__ == "__main__":
    # Small, deterministic synthetic setup (use_pretrain=False, use_NeuMF=False).
    num_users, num_items, num_factor = 32, 48, 8

    key = jax.random.PRNGKey(0)
    k1, k2, k3, k4, k5, k6 = jax.random.split(key, 6)

    # nn.init.normal_(std=0.01) for embeddings and predict weight.
    user_emb = (0.01 * jax.random.normal(k1, (num_users, num_factor))).astype(jnp.float32)
    item_emb = (0.01 * jax.random.normal(k2, (num_items, num_factor))).astype(jnp.float32)
    w = (0.01 * jax.random.normal(k3, (1, num_factor))).astype(jnp.float32)
    # nn.Linear default bias init: U(-1/sqrt(in_features), 1/sqrt(in_features)).
    bound = 1.0 / float(num_factor) ** 0.5
    b = jax.random.uniform(k4, (1, 1), minval=-bound, maxval=bound).astype(jnp.float32)

    fwd = jax.jit(gmf_forward, static_argnames=())

    # Case 1: tiny batch (single tile, heavy padding path).
    B1 = 8
    users1 = jax.random.randint(k5, (B1,), 0, num_users, dtype=jnp.int32)
    items1 = jax.random.randint(k6, (B1,), 0, num_items, dtype=jnp.int32)
    out1 = jax.block_until_ready(fwd(users1, items1, user_emb, item_emb, w, b))
    ref1 = _reference(users1, items1, user_emb, item_emb, w, b)
    assert out1.shape == (B1,), out1.shape
    assert out1.dtype == jnp.float32, out1.dtype
    assert jnp.allclose(out1, ref1, atol=1e-4, rtol=1e-4), (out1, ref1)

    # Case 2: multi-tile batch (nb >= 2, exercises padding + parallel batch axis).
    B2 = 300
    k7, k8 = jax.random.split(k5)
    users2 = jax.random.randint(k7, (B2,), 0, num_users, dtype=jnp.int32)
    items2 = jax.random.randint(k8, (B2,), 0, num_items, dtype=jnp.int32)
    out2 = jax.block_until_ready(fwd(users2, items2, user_emb, item_emb, w, b))
    ref2 = _reference(users2, items2, user_emb, item_emb, w, b)
    assert out2.shape == (B2,), out2.shape
    assert jnp.allclose(out2, ref2, atol=1e-4, rtol=1e-4), (out2, ref2)

    # TODO(synk): use_NeuMF=True path (return the raw elementwise product) is a
    # trivial variant (skip the linear + sigmoid); only the default path is wired.
    print("KERNEL_OK")
</pallas_src>

<mosaic_0001>
module attributes {stable_mosaic.version = 11 : i64} {
  func.func @gmf_kernel(%arg0: i32, %arg1: memref<8x128xbf16, #tpu.memory_space<vmem>>, %arg2: memref<8x128xbf16, #tpu.memory_space<vmem>>, %arg3: memref<8x1xf32, #tpu.memory_space<vmem>>, %arg4: memref<1x1xf32, #tpu.memory_space<smem>>, %arg5: memref<1x128xf32, #tpu.memory_space<vmem>>) attributes {dimension_semantics = [#tpu.dimension_semantics<parallel>], iteration_bounds = array<i64: 1>, scalar_prefetch = 0 : i64, scratch_operands = 0 : i64, tpu.core_type = #tpu.core_type<tc>, window_params = [{transform_indices = @transform_0, window_bounds = array<i64: 8, 128>}, {transform_indices = @transform_1, window_bounds = array<i64: 8, 128>}, {pipeline_mode = #tpu.pipeline_mode<synchronous>, transform_indices = @transform_2, window_bounds = array<i64: 8, 1>}, {transform_indices = @transform_3, window_bounds = array<i64: 1, 1>}, {transform_indices = @transform_4, window_bounds = array<i64: 1, 128>}]} {
    %c0 = arith.constant 0 : index
    %c0_0 = arith.constant 0 : index
    %0 = vector.load %arg1[%c0, %c0_0] : memref<8x128xbf16, #tpu.memory_space<vmem>>, vector<8x128xbf16>
    %1 = arith.extf %0 : vector<8x128xbf16> to vector<8x128xf32>
    %c0_1 = arith.constant 0 : index
    %c0_2 = arith.constant 0 : index
    %2 = vector.load %arg2[%c0_1, %c0_2] : memref<8x128xbf16, #tpu.memory_space<vmem>>, vector<8x128xbf16>
    %3 = arith.extf %2 : vector<8x128xbf16> to vector<8x128xf32>
    %4 = arith.mulf %1, %3 : vector<8x128xf32>
    %c0_3 = arith.constant 0 : index
    %c0_4 = arith.constant 0 : index
    %5 = vector.load %arg3[%c0_3, %c0_4] : memref<8x1xf32, #tpu.memory_space<vmem>>, vector<8x1xf32>
    %6 = vector.broadcast %5 : vector<8x1xf32> to vector<8x128xf32>
    %7 = arith.mulf %4, %6 : vector<8x128xf32>
    %cst = arith.constant dense<0.000000e+00> : vector<128xf32>
    %8 = vector.multi_reduction <add>, %7, %cst [0] : vector<8x128xf32> to vector<128xf32>
    %9 = vector.shape_cast %8 : vector<128xf32> to vector<1x128xf32>
    %c0_5 = arith.constant 0 : index
    %c0_6 = arith.constant 0 : index
    %10 = memref.load %arg4[%c0_5, %c0_6] : memref<1x1xf32, #tpu.memory_space<smem>>
    %11 = vector.broadcast %10 : f32 to vector<1x128xf32>
    %12 = arith.addf %9, %11 : vector<1x128xf32>
    %13 = arith.negf %12 : vector<1x128xf32>
    %14 = math.exp %13 : vector<1x128xf32>
    %cst_7 = arith.constant 1.000000e+00 : f32
    %15 = vector.broadcast %cst_7 : f32 to vector<1x128xf32>
    %16 = arith.addf %15, %14 : vector<1x128xf32>
    %17 = arith.divf %15, %16 : vector<1x128xf32>
    %c0_8 = arith.constant 0 : index
    %c0_9 = arith.constant 0 : index
    %18 = vector.load %arg5[%c0_8, %c0_9] : memref<1x128xf32, #tpu.memory_space<vmem>>, vector<1x128xf32>
    tpu.vector_store %arg5[%c0_8, %c0_9], %17 {strides = array<i32>} : memref<1x128xf32, #tpu.memory_space<vmem>>, vector<1x128xf32>,
    return
  }
  func.func @transform_0(%arg0: i32) -> (i32, i32) {
    %c0_i32 = arith.constant 0 : i32
    %c0_i32_0 = arith.constant 0 : i32
    return %c0_i32, %arg0 : i32, i32
  }
  func.func @transform_1(%arg0: i32) -> (i32, i32) {
    %c0_i32 = arith.constant 0 : i32
    %c0_i32_0 = arith.constant 0 : i32
    return %c0_i32, %arg0 : i32, i32
  }
  func.func @transform_2(%arg0: i32) -> (i32, i32) {
    %c0_i32 = arith.constant 0 : i32
    %c0_i32_0 = arith.constant 0 : i32
    %c0_i32_1 = arith.constant 0 : i32
    return %c0_i32, %c0_i32_0 : i32, i32
  }
  func.func @transform_3(%arg0: i32) -> (i32, i32) {
    %c0_i32 = arith.constant 0 : i32
    %c0_i32_0 = arith.constant 0 : i32
    %c0_i32_1 = arith.constant 0 : i32
    return %c0_i32, %c0_i32_0 : i32, i32
  }
  func.func @transform_4(%arg0: i32) -> (i32, i32) {
    %c0_i32 = arith.constant 0 : i32
    %c0_i32_0 = arith.constant 0 : i32
    return %c0_i32, %arg0 : i32, i32
  }
}

</mosaic_0001>

<bundles_post_ra>
// kernel: gmf_forward.1
= control target key start
LH: loop header
LB: loop body
LE: loop exit
PB: predicated region body
PF: predicated region fallthrough
CT: control target
= control target key end

     0   :  { %v57_v0 = vmov 0   ;;  %s98_s2 = inlined_call_operand.vmem [shape: f32[8,1], index: 2, kind: input, shape index: {}]   ;;  %s99_s0 = inlined_call_operand.vmem [shape: bf16[8,128], index: 0, kind: input, shape index: {}]   ;;  %s100_s1 = inlined_call_operand.vmem [shape: bf16[8,128], index: 1, kind: input, shape index: {}]   ;;  %s101_s3 = inlined_call_operand.<no memory space> [shape: f32[1,1], index: 3, kind: input, shape index: {}]   ;;  %s102_s4 = inlined_call_operand.vmem [shape: f32[1,128], index: 4, kind: output, shape index: {}]  }
   0x1   :  { %52 = vset.pattern.permute.xlu0 %v57_v0  ;;  %v23_v1 = vld [vmem:[%s98_s2] sm:$0xff]  ;;  %v37_v14 = vstv %s101_s3 }
   0x2   :  { %26 = vperm.xlu0 %52, %v23_v1   ;;  %v18_v2 = vld [vmem:[%s99_s0] sm:$0xf] }
   0x3   :  { %v20_v3 = vld [vmem:[%s100_s1] sm:$0xf]  ;;  %v19_v4 = vunpack.c.l.bf16 %v18_v2 }
   0x4   :  { %v21_v5 = vunpack.c.l.bf16 %v20_v3 }
   0x6   :  { %v22_v6 = vmul.f32 %v21_v5, %v19_v4 }
  0x81   :  { %v27_v7 = vpop.permute.xlu0 %26 }
  0x82   :  { %v29_v8 = vmul.f32 %v27_v7, %v22_v6 }
  0x84   :  { %v30_v9 = vrot.slane %v29_v8, 4 }
  0x86   :  { %v31_v10 = vadd.f32 %v30_v9, %v29_v8 }
  0x88   :  { %v32_v11 = vrot.slane %v31_v10, 2 }
  0x8a   :  { %v33_v12 = vadd.f32 %v32_v11, %v31_v10 }
  0x8c   :  { %v34_v13 = vrot.slane %v33_v12, 1 }
  0x8e   :  { %v35_v15 = vadd.f32 %v34_v13, %v33_v12 }
  0x90   :  { %v38_v16 = vadd.f32 %v37_v14, %v35_v15 }
  0x92   :  { %v50_v17 = vmul.f32 -1.442695, %v38_v16 }
  0x94   :  { %53 = vpow2.f32 %v50_v17 }
  0x9e   :  { %v54_v18 = vpop.eup %53 }
  0x9f   :  { %v42_v19 = vadd.f32 1.0, %v54_v18 }
  0xa1   :  { %55 = vrcp.f32 %v42_v19 }
  0xab   :  { %v56_v20 = vpop.eup %55 }
  0xac   :  { %45 = vst [vmem:[%s102_s4] sm:$0x1] %v56_v20 }

</bundles_post_ra>
